<compile_context>
chip_gen: v7x
topology: tpu7x:2x2x1
jax: 0.10.0
libtpu: 0.0.40
codegen_flags: <defaults>
</compile_context>

<pallas_src>
import numpy as np
import jax
import jax.numpy as jnp
from jax.experimental import pallas as pl
from jax.experimental.pallas import tpu as pltpu

LANE = 128
SUB = 32   # sublane granularity: int8 min tile (covers bf16 (16) and f32 (8) too)


def _round_up(x, m):
    return ((x + m - 1) // m) * m


def _make_mean_loss_kernel(num_groups, acc_rows):
    """Kernel for a fixed (static) group count; accumulates into the out block.

    acc row layout: [0:G) = masked BCE sums, [G:2G) = labeled counts,
    [2G:acc_rows) = zero padding.  Sums are kept lane-partial ([., 128]); the
    lane reduction + per-group division happen in the tiny JAX combine.
    """

    def kernel(pred_ref, gt_ref, code_ref, acc_ref):
        i = pl.program_id(1)            # reduction axis (row tiles of this split)

        @pl.when(i == 0)
        def _init():
            acc_ref[...] = jnp.zeros_like(acc_ref)

        pred = pred_ref[...].astype(jnp.float32)
        gt = gt_ref[...].astype(jnp.float32)
        code = code_ref[...].astype(jnp.int32)      # single unpack per tile

        # Numerically stable BCE-with-logits (same formula torch uses).
        # exp / log1p run on the EUP slot, which has slack under the group loop.
        bce = (jnp.maximum(pred, 0.0) - pred * gt
               + jnp.log1p(jnp.exp(-jnp.abs(pred))))

        gl_parts, gc_parts = [], []
        for g in range(num_groups):                 # real groups only
            eq = code == g                          # one compare, reused twice
            gl_parts.append(jnp.sum(jnp.where(eq, bce, 0.0),
                                    axis=0, keepdims=True))      # [1, 128]
            gc_parts.append(jnp.sum(jnp.where(eq, 1.0, 0.0),
                                    axis=0, keepdims=True))      # [1, 128]
        parts = gl_parts + gc_parts
        pad_rows = acc_rows - 2 * num_groups
        if pad_rows:
            parts.append(jnp.zeros((pad_rows, LANE), jnp.float32))
        acc_ref[...] += jnp.concatenate(parts, axis=0)           # single += store

    return kernel


def mean_loss_pallas(pred, gt, domain, uniq, *, max_rows=2048, n_splits=2,
                     input_dtype=jnp.float32):
    """pred, gt: [N, T] float; domain: [N] int; uniq: [G] int (unique domain ids).

    max_rows:    max tile height (rows of 128 lanes) per grid step.
    n_splits:    leading "parallel" grid axis (2 uses both v7x TensorCores;
                 harmless sequential loop on v5e/v6e).
    input_dtype: HBM->VMEM ingress dtype for pred/gt (f32 or bf16); kernel math
                 is always f32.  bf16 roughly halves HBM bytes on v5e.
    """
    n, t = pred.shape
    g = int(uniq.shape[0])
    assert 1 <= g <= 127, "group count must fit the int8 code slab"
    total = n * t

    # ---- host-side lane-dense repack ---------------------------------------
    # TODO(synk): for production, produce these packed slabs once upstream in
    # the data pipeline (or cache per batch shape); for a kernel this light the
    # repack's extra HBM read+write is comparable to the kernel itself.
    uniq_sorted = jnp.sort(uniq.astype(jnp.int32))
    gidx = jnp.searchsorted(uniq_sorted, domain.astype(jnp.int32))      # [N]
    labeled = jnp.logical_not(jnp.isnan(gt))                            # [N, T]
    code = jnp.where(labeled, gidx[:, None], -1).astype(jnp.int8)       # [N, T]
    gt_clean = jnp.where(labeled, gt, 0.0)                              # NaN-free

    rows = max(1, -(-total // LANE))
    bm = min(_round_up(int(max_rows), SUB), _round_up(rows, SUB))
    tiles = -(-rows // bm)
    splits = max(1, min(int(n_splits), tiles))
    tiles_per_split = -(-tiles // splits)
    m_tot = splits * tiles_per_split * bm
    pad = m_tot * LANE - total

    pred_slab = jnp.pad(pred.astype(input_dtype).reshape(-1),
                        (0, pad)).reshape(m_tot, LANE)
    gt_slab = jnp.pad(gt_clean.astype(input_dtype).reshape(-1),
                      (0, pad)).reshape(m_tot, LANE)
    code_slab = jnp.pad(code.reshape(-1), (0, pad),
                        constant_values=-1).reshape(m_tot, LANE)

    acc_rows = _round_up(2 * g, 8)

    itemsize = jnp.dtype(input_dtype).itemsize
    cost = pl.CostEstimate(
        flops=int(m_tot) * LANE * (8 + 5 * g),
        transcendentals=int(m_tot) * LANE * 2,
        bytes_accessed=int(m_tot) * LANE * (2 * itemsize + 1)
        + splits * acc_rows * LANE * 4,
    )

    idx = lambda c, i: (c * tiles_per_split + i, 0)
    grid_spec = pltpu.PrefetchScalarGridSpec(
        num_scalar_prefetch=0,
        grid=(splits, tiles_per_split),
        in_specs=[pl.BlockSpec((bm, LANE), idx),     # pred slab
                  pl.BlockSpec((bm, LANE), idx),     # gt slab
                  pl.BlockSpec((bm, LANE), idx)],    # int8 code slab
        out_specs=pl.BlockSpec((acc_rows, LANE), lambda c, i: (c, 0)),
    )

    out = pl.pallas_call(
        _make_mean_loss_kernel(g, acc_rows),
        out_shape=jax.ShapeDtypeStruct((splits * acc_rows, LANE), jnp.float32),
        grid_spec=grid_spec,
        compiler_params=pltpu.CompilerParams(
            dimension_semantics=("parallel", "arbitrary")),
        cost_estimate=cost,
    )(pred_slab, gt_slab, code_slab)

    # ---- tiny O(G) combine: cross-split + lane reduce + per-group mean -----
    parts = out.reshape(splits, acc_rows, LANE)
    gl = jnp.sum(parts[:, :g, :], axis=(0, 2))            # [G] BCE sums
    gc = jnp.sum(parts[:, g:2 * g, :], axis=(0, 2))       # [G] labeled counts
    # Unguarded division: a group with zero labeled entries yields NaN, exactly
    # like torch's BCE mean over an empty selection.
    return jnp.sum(gl / gc) / g


def mean_loss_reference(pred, gt, domain, uniq):
    """Pure numpy reference mirroring the PyTorch forward."""
    pred = np.asarray(pred, dtype=np.float64)
    gt = np.asarray(gt, dtype=np.float64)
    domain = np.asarray(domain)
    total, cnt = 0.0, 0
    for g in np.asarray(uniq):
        idx = np.where(domain == g)[0]
        p, y = pred[idx], gt[idx]
        m = y == y
        p, y = p[m], y[m]
        bce = np.maximum(p, 0.0) - p * y + np.log1p(np.exp(-np.abs(p)))
        total += bce.mean()
        cnt += 1
    return total / cnt


if __name__ == "__main__":
    key = jax.random.PRNGKey(0)

    def make_inputs(k, n, t, num_domains, nan_frac=0.1):
        k1, k2, k3, k4 = jax.random.split(k, 4)
        pred = jax.random.normal(k1, (n, t), dtype=jnp.float32)
        gt = jax.random.bernoulli(k2, 0.5, (n, t)).astype(jnp.float32)
        gt = jnp.where(jax.random.bernoulli(k3, nan_frac, (n, t)), jnp.nan, gt)
        domain = jax.random.randint(k4, (n,), 0, num_domains, dtype=jnp.int32)
        uniq = jnp.asarray(np.unique(np.asarray(domain)), dtype=jnp.int32)
        return pred, gt, domain, uniq

    ka, kb = jax.random.split(key)

    # Small OGB-style batch: 512 molecules x 4 tasks, 5 environments/domains.
    pred, gt, domain, uniq = make_inputs(ka, 512, 4, 5)
    ref = mean_loss_reference(np.asarray(pred), np.asarray(gt),
                              np.asarray(domain), np.asarray(uniq))
    out = jax.block_until_ready(mean_loss_pallas(pred, gt, domain, uniq))
    assert np.allclose(np.asarray(out), ref, rtol=1e-5, atol=1e-5), (float(out), ref)

    # Larger batch forcing the multi-tile accumulation + two-split (megacore) path.
    pred2, gt2, domain2, uniq2 = make_inputs(kb, 4096, 4, 7)
    ref2 = mean_loss_reference(np.asarray(pred2), np.asarray(gt2),
                               np.asarray(domain2), np.asarray(uniq2))
    out2 = jax.block_until_ready(
        mean_loss_pallas(pred2, gt2, domain2, uniq2, max_rows=32, n_splits=2))
    assert np.allclose(np.asarray(out2), ref2, rtol=1e-5, atol=1e-5), (float(out2), ref2)

    # bf16 ingress (halves HBM bytes on v5e); math stays f32 -> loose tolerance.
    out3 = jax.block_until_ready(
        mean_loss_pallas(pred2, gt2, domain2, uniq2, input_dtype=jnp.bfloat16))
    assert np.allclose(np.asarray(out3), ref2, rtol=1e-2, atol=1e-2), (float(out3), ref2)

    print("KERNEL_OK")
</pallas_src>

<mosaic_0001>
module attributes {stable_mosaic.version = 11 : i64} {
  func.func @kernel(%arg0: i32, %arg1: i32, %arg2: memref<32x128xf32, #tpu.memory_space<vmem>>, %arg3: memref<32x128xf32, #tpu.memory_space<vmem>>, %arg4: memref<32x128xi8, #tpu.memory_space<vmem>>, %arg5: memref<16x128xf32, #tpu.memory_space<vmem>>) attributes {dimension_semantics = [#tpu.dimension_semantics<parallel>, #tpu.dimension_semantics<arbitrary>], iteration_bounds = array<i64: 1, 1>, scalar_prefetch = 0 : i64, scratch_operands = 0 : i64, tpu.core_type = #tpu.core_type<tc>, window_params = [{transform_indices = @transform_0, window_bounds = array<i64: 32, 128>}, {transform_indices = @transform_1, window_bounds = array<i64: 32, 128>}, {transform_indices = @transform_2, window_bounds = array<i64: 32, 128>}, {transform_indices = @transform_3, window_bounds = array<i64: 16, 128>}]} {
    %c0_i32 = arith.constant 0 : i32
    %0 = arith.cmpi eq, %arg1, %c0_i32 : i32
    %1 = arith.extui %0 : i1 to i32
    %c0_i32_0 = arith.constant 0 : i32
    %2 = arith.cmpi ne, %1, %c0_i32_0 : i32
    scf.if %2 {
      %cst_38 = arith.constant 0.000000e+00 : f32
      %77 = vector.broadcast %cst_38 : f32 to vector<16x128xf32>
      %c0_39 = arith.constant 0 : index
      %c0_40 = arith.constant 0 : index
      %78 = vector.load %arg5[%c0_39, %c0_40] : memref<16x128xf32, #tpu.memory_space<vmem>>, vector<16x128xf32>
      tpu.vector_store %arg5[%c0_39, %c0_40], %77 {strides = array<i32>} : memref<16x128xf32, #tpu.memory_space<vmem>>, vector<16x128xf32>,
    } else {
    }
    %c0 = arith.constant 0 : index
    %c0_1 = arith.constant 0 : index
    %3 = vector.load %arg2[%c0, %c0_1] : memref<32x128xf32, #tpu.memory_space<vmem>>, vector<32x128xf32>
    %c0_2 = arith.constant 0 : index
    %c0_3 = arith.constant 0 : index
    %4 = vector.load %arg3[%c0_2, %c0_3] : memref<32x128xf32, #tpu.memory_space<vmem>>, vector<32x128xf32>
    %c0_4 = arith.constant 0 : index
    %c0_5 = arith.constant 0 : index
    %5 = vector.load %arg4[%c0_4, %c0_5] : memref<32x128xi8, #tpu.memory_space<vmem>>, vector<32x128xi8>
    %6 = arith.extsi %5 : vector<32x128xi8> to vector<32x128xi32>
    %cst = arith.constant 0.000000e+00 : f32
    %7 = vector.broadcast %cst : f32 to vector<32x128xf32>
    %8 = arith.maximumf %3, %7 : vector<32x128xf32>
    %9 = arith.mulf %3, %4 : vector<32x128xf32>
    %10 = arith.subf %8, %9 : vector<32x128xf32>
    %11 = math.absf %3 : vector<32x128xf32>
    %cst_6 = arith.constant 0.000000e+00 : f32
    %12 = vector.broadcast %cst_6 : f32 to vector<32x128xf32>
    %13 = arith.subf %12, %11 : vector<32x128xf32>
    %14 = math.exp %13 : vector<32x128xf32>
    %15 = math.log1p %14 : vector<32x128xf32>
    %16 = arith.addf %10, %15 : vector<32x128xf32>
    %c0_i32_7 = arith.constant 0 : i32
    %17 = vector.broadcast %c0_i32_7 : i32 to vector<32x128xi32>
    %18 = arith.cmpi eq, %6, %17 : vector<32x128xi32>
    %cst_8 = arith.constant 0.000000e+00 : f32
    %19 = vector.broadcast %cst_8 : f32 to vector<32x128xf32>
    %20 = arith.select %18, %16, %19 : vector<32x128xi1>, vector<32x128xf32>
    %cst_9 = arith.constant dense<0.000000e+00> : vector<128xf32>
    %21 = vector.multi_reduction <add>, %20, %cst_9 [0] : vector<32x128xf32> to vector<128xf32>
    %22 = vector.shape_cast %21 : vector<128xf32> to vector<1x128xf32>
    %cst_10 = arith.constant 1.000000e+00 : f32
    %cst_11 = arith.constant 0.000000e+00 : f32
    %23 = vector.broadcast %cst_10 : f32 to vector<32x128xf32>
    %24 = vector.broadcast %cst_11 : f32 to vector<32x128xf32>
    %25 = arith.select %18, %23, %24 : vector<32x128xi1>, vector<32x128xf32>
    %cst_12 = arith.constant dense<0.000000e+00> : vector<128xf32>
    %26 = vector.multi_reduction <add>, %25, %cst_12 [0] : vector<32x128xf32> to vector<128xf32>
    %27 = vector.shape_cast %26 : vector<128xf32> to vector<1x128xf32>
    %c1_i32 = arith.constant 1 : i32
    %28 = vector.broadcast %c1_i32 : i32 to vector<32x128xi32>
    %29 = arith.cmpi eq, %6, %28 : vector<32x128xi32>
    %cst_13 = arith.constant 0.000000e+00 : f32
    %30 = vector.broadcast %cst_13 : f32 to vector<32x128xf32>
    %31 = arith.select %29, %16, %30 : vector<32x128xi1>, vector<32x128xf32>
    %cst_14 = arith.constant dense<0.000000e+00> : vector<128xf32>
    %32 = vector.multi_reduction <add>, %31, %cst_14 [0] : vector<32x128xf32> to vector<128xf32>
    %33 = vector.shape_cast %32 : vector<128xf32> to vector<1x128xf32>
    %cst_15 = arith.constant 1.000000e+00 : f32
    %cst_16 = arith.constant 0.000000e+00 : f32
    %34 = vector.broadcast %cst_15 : f32 to vector<32x128xf32>
    %35 = vector.broadcast %cst_16 : f32 to vector<32x128xf32>
    %36 = arith.select %29, %34, %35 : vector<32x128xi1>, vector<32x128xf32>
    %cst_17 = arith.constant dense<0.000000e+00> : vector<128xf32>
    %37 = vector.multi_reduction <add>, %36, %cst_17 [0] : vector<32x128xf32> to vector<128xf32>
    %38 = vector.shape_cast %37 : vector<128xf32> to vector<1x128xf32>
    %c2_i32 = arith.constant 2 : i32
    %39 = vector.broadcast %c2_i32 : i32 to vector<32x128xi32>
    %40 = arith.cmpi eq, %6, %39 : vector<32x128xi32>
    %cst_18 = arith.constant 0.000000e+00 : f32
    %41 = vector.broadcast %cst_18 : f32 to vector<32x128xf32>
    %42 = arith.select %40, %16, %41 : vector<32x128xi1>, vector<32x128xf32>
    %cst_19 = arith.constant dense<0.000000e+00> : vector<128xf32>
    %43 = vector.multi_reduction <add>, %42, %cst_19 [0] : vector<32x128xf32> to vector<128xf32>
    %44 = vector.shape_cast %43 : vector<128xf32> to vector<1x128xf32>
    %cst_20 = arith.constant 1.000000e+00 : f32
    %cst_21 = arith.constant 0.000000e+00 : f32
    %45 = vector.broadcast %cst_20 : f32 to vector<32x128xf32>
    %46 = vector.broadcast %cst_21 : f32 to vector<32x128xf32>
    %47 = arith.select %40, %45, %46 : vector<32x128xi1>, vector<32x128xf32>
    %cst_22 = arith.constant dense<0.000000e+00> : vector<128xf32>
    %48 = vector.multi_reduction <add>, %47, %cst_22 [0] : vector<32x128xf32> to vector<128xf32>
    %49 = vector.shape_cast %48 : vector<128xf32> to vector<1x128xf32>
    %c3_i32 = arith.constant 3 : i32
    %50 = vector.broadcast %c3_i32 : i32 to vector<32x128xi32>
    %51 = arith.cmpi eq, %6, %50 : vector<32x128xi32>
    %cst_23 = arith.constant 0.000000e+00 : f32
    %52 = vector.broadcast %cst_23 : f32 to vector<32x128xf32>
    %53 = arith.select %51, %16, %52 : vector<32x128xi1>, vector<32x128xf32>
    %cst_24 = arith.constant dense<0.000000e+00> : vector<128xf32>
    %54 = vector.multi_reduction <add>, %53, %cst_24 [0] : vector<32x128xf32> to vector<128xf32>
    %55 = vector.shape_cast %54 : vector<128xf32> to vector<1x128xf32>
    %cst_25 = arith.constant 1.000000e+00 : f32
    %cst_26 = arith.constant 0.000000e+00 : f32
    %56 = vector.broadcast %cst_25 : f32 to vector<32x128xf32>
    %57 = vector.broadcast %cst_26 : f32 to vector<32x128xf32>
    %58 = arith.select %51, %56, %57 : vector<32x128xi1>, vector<32x128xf32>
    %cst_27 = arith.constant dense<0.000000e+00> : vector<128xf32>
    %59 = vector.multi_reduction <add>, %58, %cst_27 [0] : vector<32x128xf32> to vector<128xf32>
    %60 = vector.shape_cast %59 : vector<128xf32> to vector<1x128xf32>
    %c4_i32 = arith.constant 4 : i32
    %61 = vector.broadcast %c4_i32 : i32 to vector<32x128xi32>
    %62 = arith.cmpi eq, %6, %61 : vector<32x128xi32>
    %cst_28 = arith.constant 0.000000e+00 : f32
    %63 = vector.broadcast %cst_28 : f32 to vector<32x128xf32>
    %64 = arith.select %62, %16, %63 : vector<32x128xi1>, vector<32x128xf32>
    %cst_29 = arith.constant dense<0.000000e+00> : vector<128xf32>
    %65 = vector.multi_reduction <add>, %64, %cst_29 [0] : vector<32x128xf32> to vector<128xf32>
    %66 = vector.shape_cast %65 : vector<128xf32> to vector<1x128xf32>
    %cst_30 = arith.constant 1.000000e+00 : f32
    %cst_31 = arith.constant 0.000000e+00 : f32
    %67 = vector.broadcast %cst_30 : f32 to vector<32x128xf32>
    %68 = vector.broadcast %cst_31 : f32 to vector<32x128xf32>
    %69 = arith.select %62, %67, %68 : vector<32x128xi1>, vector<32x128xf32>
    %cst_32 = arith.constant dense<0.000000e+00> : vector<128xf32>
    %70 = vector.multi_reduction <add>, %69, %cst_32 [0] : vector<32x128xf32> to vector<128xf32>
    %71 = vector.shape_cast %70 : vector<128xf32> to vector<1x128xf32>
    %cst_33 = arith.constant 0.000000e+00 : f32
    %72 = vector.broadcast %cst_33 : f32 to vector<6x128xf32>
    %c0_34 = arith.constant 0 : index
    %c0_35 = arith.constant 0 : index
    %73 = vector.load %arg5[%c0_34, %c0_35] : memref<16x128xf32, #tpu.memory_space<vmem>>, vector<16x128xf32>
    %74 = tpu.concatenate %22, %33, %44, %55, %66, %27, %38, %49, %60, %71, %72 in 0 : vector<1x128xf32>, vector<1x128xf32>, vector<1x128xf32>, vector<1x128xf32>, vector<1x128xf32>, vector<1x128xf32>, vector<1x128xf32>, vector<1x128xf32>, vector<1x128xf32>, vector<1x128xf32>, vector<6x128xf32> -> vector<16x128xf32>
    %75 = arith.addf %73, %74 : vector<16x128xf32>
    %c0_36 = arith.constant 0 : index
    %c0_37 = arith.constant 0 : index
    %76 = vector.load %arg5[%c0_36, %c0_37] : memref<16x128xf32, #tpu.memory_space<vmem>>, vector<16x128xf32>
    tpu.vector_store %arg5[%c0_36, %c0_37], %75 {strides = array<i32>} : memref<16x128xf32, #tpu.memory_space<vmem>>, vector<16x128xf32>,
    return
  }
  func.func @transform_0(%arg0: i32, %arg1: i32) -> (i32, i32) {
    %c1_i32 = arith.constant 1 : i32
    %0 = arith.muli %arg0, %c1_i32 : i32
    %1 = arith.addi %0, %arg1 : i32
    %c0_i32 = arith.constant 0 : i32
    %c0_i32_0 = arith.constant 0 : i32
    return %1, %c0_i32 : i32, i32
  }
  func.func @transform_1(%arg0: i32, %arg1: i32) -> (i32, i32) {
    %c1_i32 = arith.constant 1 : i32
    %0 = arith.muli %arg0, %c1_i32 : i32
    %1 = arith.addi %0, %arg1 : i32
    %c0_i32 = arith.constant 0 : i32
    %c0_i32_0 = arith.constant 0 : i32
    return %1, %c0_i32 : i32, i32
  }
  func.func @transform_2(%arg0: i32, %arg1: i32) -> (i32, i32) {
    %c1_i32 = arith.constant 1 : i32
    %0 = arith.muli %arg0, %c1_i32 : i32
    %1 = arith.addi %0, %arg1 : i32
    %c0_i32 = arith.constant 0 : i32
    %c0_i32_0 = arith.constant 0 : i32
    return %1, %c0_i32 : i32, i32
  }
  func.func @transform_3(%arg0: i32, %arg1: i32) -> (i32, i32) {
    %c0_i32 = arith.constant 0 : i32
    %c0_i32_0 = arith.constant 0 : i32
    return %arg0, %c0_i32 : i32, i32
  }
}

</mosaic_0001>

<bundles_post_ra>
// kernel: tpu_custom_call.1
= control target key start
LH: loop header
LB: loop body
LE: loop exit
PB: predicated region body
PF: predicated region fallthrough
CT: control target
= control target key end

     0   :  { %8 = vsyncpa [#allocation3], 0  ;;  %s747_s0 = inlined_call_operand.hbm [shape: f32[32,128], index: 0, kind: input, shape index: {}]   ;;  %s748_s1 = inlined_call_operand.hbm [shape: f32[32,128], index: 1, kind: input, shape index: {}]   ;;  %s749_s2 = inlined_call_operand.hbm [shape: s8[32,128], index: 2, kind: input, shape index: {}]   ;;  %s750_s3 = inlined_call_operand.hbm [shape: f32[16,128], index: 3, kind: output, shape index: {}]  }
   0x1   :  { %9 = vsyncpa [#allocation6], 0 }
   0x2   :  { %10 = vsyncpa [#allocation4], 0  ;;  %s464_s12 = smov [#allocation5]   ;;  %s465_s14 = smov [#allocation2]  }
   0x3   :  { %s36_s13 = sshll.u32 %s464_s12, 4  ;;  %s20_s15 = sshll.u32 %s465_s14, 4  ;;  %s37_s13 = int_to_ptr.vmem [resolvable:$true] %s36_s13  ;;  %s491_s15 = int_to_ptr.vmem [resolvable:$true] %s20_s15 }
   0x4   :  { %s370_s18 = scalar_lea.hbm %s748_s1, 512 }
   0x5   :  { %p371_p0 = scmp.ne.s32.totalorder %s748_s1, %s370_s18  ;;  %p374_p1 = scmp.lt.u32.totalorder %s370_s18, %s748_s1 }
   0x7   :  { %p376_p2 = pnand %p374_p1, %p371_p0 }
   0x9   :  { %379 = shalt.err (!%p376_p2)
}
   0xa   :  { %s380_s23 = scalar_lea.vmem %s37_s13, 512  ;;  %p385_p4 = scmp.lt.s32.totalorder %s37_s13, %s37_s13 }
   0xb   :  { %p381_p3 = scmp.ne.s32.totalorder %s37_s13, %s380_s23  ;;  %p386_p5 = scmp.lt.s32.totalorder %s380_s23, %s380_s23 }
   0xd   :  { %p387_p6 = por %p386_p5, %p385_p4 }
   0xf   :  { %p388_p7 = pnand %p387_p6, %p381_p3 }
  0x11   :  { %391 = shalt.err (!%p388_p7)
}
  0x12   :  { %s466_s24 = smov 128   ;;  %s467_s25 = smov 8  }
  0x13   :  { %42 = dma.hbm_to_vmem [thread:$0]  %s748_s1, 512, %s37_s13, [#allocation6], %s466_s24, %s466_s24, %s467_s25  }
  0x14   :  { %s392_s30 = scalar_lea.hbm %s747_s0, 512 }
  0x15   :  { %p393_p8 = scmp.ne.s32.totalorder %s747_s0, %s392_s30  ;;  %p396_p9 = scmp.lt.u32.totalorder %s392_s30, %s747_s0 }
  0x17   :  { %p398_p10 = pnand %p396_p9, %p393_p8 }
  0x19   :  { %401 = shalt.err (!%p398_p10)
}
  0x1a   :  { %s402_s8 = scalar_lea.vmem %s491_s15, 512  ;;  %p407_p12 = scmp.lt.s32.totalorder %s491_s15, %s491_s15 }
  0x1b   :  { %p403_p11 = scmp.ne.s32.totalorder %s491_s15, %s402_s8  ;;  %p408_p13 = scmp.lt.s32.totalorder %s402_s8, %s402_s8 }
  0x1d   :  { %p409_p0 = por %p408_p13, %p407_p12 }
  0x1f   :  { %p410_p1 = pnand %p409_p0, %p403_p11 }
  0x21   :  { %413 = shalt.err (!%p410_p1)
}
  0x22   :  { %26 = dma.hbm_to_vmem [thread:$0]  %s747_s0, 512, %s491_s15, [#allocation3], %s466_s24, %s466_s24, %s467_s25  }
  0x23   :  { %s468_s10 = smov [#allocation7]   ;;  %s414_s14 = scalar_lea.hbm %s749_s2, 128 }
  0x24   :  { %s52_s11 = sshll.u32 %s468_s10, 4  ;;  %p415_p2 = scmp.ne.s32.totalorder %s749_s2, %s414_s14  ;;  %s53_s11 = int_to_ptr.vmem [resolvable:$true] %s52_s11 }
  0x25   :  { %p418_p3 = scmp.lt.u32.totalorder %s414_s14, %s749_s2 }
  0x27   :  { %p420_p4 = pnand %p418_p3, %p415_p2 }
  0x29   :  { %423 = shalt.err (!%p420_p4)
}
  0x2a   :  { %s424_s20 = scalar_lea.vmem %s53_s11, 128  ;;  %p429_p6 = scmp.lt.s32.totalorder %s53_s11, %s53_s11 }
  0x2b   :  { %p425_p5 = scmp.ne.s32.totalorder %s53_s11, %s424_s20  ;;  %p430_p7 = scmp.lt.s32.totalorder %s424_s20, %s424_s20 }
  0x2d   :  { %p431_p8 = por %p430_p7, %p429_p6 }
  0x2f   :  { %p432_p9 = pnand %p431_p8, %p425_p5 }
  0x31   :  { %435 = shalt.err (!%p432_p9)
}
  0x32   :  { %55 = dma.hbm_to_vmem [thread:$0]  %s749_s2, 128, %s53_s11, [#allocation6]  }
  0x33   :  { %458 = dma.done.wait [#allocation3], 512  }
  0x34   :  { %459 = vsyncadd [#allocation3], 4294966784 }
  0x35   :  { %460 = dma.done.wait [#allocation6], 640  }
  0x36   :  { %461 = vsyncadd [#allocation6], 4294966656  ;;  %v76_v0 = vld [vmem:[#allocation2] sm:$0xff]  ;;  %v77_v1 = vld [vmem:[#allocation2 + $0x8] sm:$0xff]  ;;  %v469_v18 = vmov 0.0   ;;  %s470_s2 = smov [#allocation8]  }
  0x37   :  { %v540_v2 = vld [vmem:[#allocation2 + $0x10] sm:$0xff]  ;;  %v542_v3 = vld [vmem:[#allocation2 + $0x18] sm:$0xff]  ;;  %v84_v4 = vld [vmem:[#allocation7] sm:$0xff]  ;;  %v101_v5 = vand.u32 2147483647, %v76_v0  ;;  %v89_v26 = vmax.f32 %v76_v0, 0.0 }
  0x38   :  { %v544_v6 = vunpack.c.0.s8 %v84_v4  ;;  %v546_v7 = vunpack.c.1.s8 %v84_v4  ;;  %v548_v8 = vunpack.c.2.s8 %v84_v4  ;;  %v102_v9 = vand.u32 2147483647, %v77_v1  ;;  %v80_v16 = vld [vmem:[#allocation5] sm:$0xff]  ;;  %v81_v28 = vld [vmem:[#allocation5 + $0x8] sm:$0xff]  ;;  %v82_v31 = vld [vmem:[#allocation5 + $0x10] sm:$0xff]  ;;  %s334_s21 = sshll.u32 %s470_s2, 4  ;;  %s335_s21 = int_to_ptr.vmem [resolvable:$true] %s334_s21 }
  0x39   :  { %v103_v10 = vand.u32 2147483647, %v540_v2  ;;  %v104_v11 = vand.u32 2147483647, %v542_v3  ;;  %v105_v12 = vsub.f32 0.0, %v101_v5  ;;  %v558_v20 = vunpack.c.3.s8 %v84_v4  ;;  %v83_v32 = vld [vmem:[#allocation5 + $0x18] sm:$0xff]  ;;  %p441_p11 = scmp.lt.s32.totalorder %s335_s21, %s335_s21 }
  0x3a   :  { %v106_v13 = vsub.f32 0.0, %v102_v9  ;;  %vm157_vm0 = vcmp.eq.s32.totalorder %v544_v6, 0  ;;  %vm158_vm1 = vcmp.eq.s32.totalorder %v546_v7, 0  ;;  %vm159_vm2 = vcmp.eq.s32.totalorder %v548_v8, 0  ;;  %s436_s22 = scalar_lea.vmem %s335_s21, 256 }
  0x3b   :  { %v107_v14 = vsub.f32 0.0, %v103_v10  ;;  %v108_v15 = vsub.f32 0.0, %v104_v11  ;;  %v109_v17 = vmul.f32 1.442695, %v105_v12  ;;  %v174_v19 = vsel %vm157_vm0, 1.0, %v469_v18  ;;  %p437_p10 = scmp.ne.s32.totalorder %s335_s21, %s436_s22  ;;  %p442_p12 = scmp.lt.s32.totalorder %s436_s22, %s436_s22 }
  0x3c   :  { %v111_v21 = vmul.f32 1.442695, %v106_v13  ;;  %v175_v24 = vsel %vm158_vm1, 1.0, %v469_v18  ;;  %v176_v25 = vsel %vm159_vm2, 1.0, %v469_v18  ;;  %vm187_vm3 = vcmp.eq.s32.totalorder %v544_v6, 1 }
  0x3d   :  { %v113_v22 = vmul.f32 1.442695, %v107_v14  ;;  %v115_v23 = vmul.f32 1.442695, %v108_v15  ;;  %354 = vpow2.f32 %v109_v17  ;;  %v178_v27 = vadd.f32 %v175_v24, %v174_v19  ;;  %p443_p13 = por %p442_p12, %p441_p11 }
  0x3e   :  { %356 = vpow2.f32 %v111_v21  ;;  %v93_v29 = vmul.f32 %v80_v16, %v76_v0  ;;  %vm188_vm4 = vcmp.eq.s32.totalorder %v546_v7, 1  ;;  %v204_v30 = vsel %vm187_vm3, 1.0, %v469_v18 }
  0x3f   :  { %358 = vpow2.f32 %v113_v22  ;;  %vm753_vm5 = vcmp.eq.s32.totalorder %v558_v20, 0  ;;  %v179_v33 = vadd.f32 %v178_v27, %v176_v25  ;;  %v205_v34 = vsel %vm188_vm4, 1.0, %v469_v18  ;;  %p444_p0 = pnand %p443_p13, %p437_p10 }
  0x40   :  { %360 = vpow2.f32 %v115_v23  ;;  %v177_v35 = vsel %vm753_vm5, 1.0, %v469_v18  ;;  %vm189_vm6 = vcmp.eq.s32.totalorder %v548_v8, 1  ;;  %v208_v36 = vadd.f32 %v205_v34, %v204_v30 }
  0x41   :  { %v90_v37 = vmax.f32 %v77_v1, 0.0  ;;  %v94_v38 = vmul.f32 %v81_v28, %v77_v1  ;;  %v206_v39 = vsel %vm189_vm6, 1.0, %v469_v18  ;;  %v91_v40 = vmax.f32 %v540_v2, 0.0 }
  0x42   :  { %v92_v41 = vmax.f32 %v542_v3, 0.0  ;;  %v95_v42 = vmul.f32 %v82_v31, %v540_v2  ;;  %v96_v43 = vmul.f32 %v83_v32, %v542_v3  ;;  %v586_v44 = vsub.f32 %v89_v26, %v93_v29 }
  0x43   :  { %v180_v45 = vadd.f32 %v179_v33, %v177_v35  ;;  %vm751_vm7 = vcmp.eq.s32.totalorder %v558_v20, 1  ;;  %v209_v46 = vadd.f32 %v208_v36, %v206_v39  ;;  %vm217_vm8 = vcmp.eq.s32.totalorder %v544_v6, 2 }
  0x44   :  { %vm218_vm9 = vcmp.eq.s32.totalorder %v546_v7, 2  ;;  %v591_v47 = vsub.f32 %v90_v37, %v94_v38  ;;  %v207_v48 = vsel %vm751_vm7, 1.0, %v469_v18  ;;  %v234_v49 = vsel %vm217_vm8, 1.0, %v469_v18 }
  0x45   :  { %v235_v50 = vsel %vm218_vm9, 1.0, %v469_v18  ;;  %v602_v52 = vsub.f32 %v91_v40, %v95_v42  ;;  %v604_v53 = vsub.f32 %v92_v41, %v96_v43  ;;  %vm754_vm10 = vcmp.eq.s32.totalorder %v548_v8, 2 }
  0x46   :  { %vm752_vm11 = vcmp.eq.s32.totalorder %v558_v20, 2  ;;  %v181_v56 = vrot.slane %v180_v45, 4  ;;  %v236_v57 = vsel %vm754_vm10, 1.0, %v469_v18  ;;  %v210_v61 = vadd.f32 %v209_v46, %v207_v48 }
  0x47   :  { %v355_v51 = vpop.eup %354  ;;  %v237_v58 = vsel %vm752_vm11, 1.0, %v469_v18  ;;  %v238_v62 = vadd.f32 %v235_v50, %v234_v49  ;;  %vm247_vm12 = vcmp.eq.s32.totalorder %v544_v6, 3  ;;  %vm755_vm13 = vcmp.eq.s32.totalorder %v546_v7, 3 }
  0x48   :  { %v357_v54 = vpop.eup %356  ;;  %v117_v55 = vadd.f32 1.0, %v355_v51  ;;  %vm757_vm14 = vcmp.eq.s32.totalorder %v548_v8, 3  ;;  %v120_v1 = vmul.f32 -0.5, %v355_v51  ;;  %vm250_vm15 = vcmp.eq.s32.totalorder %v558_v20, 3 }
  0x49   :  { %v359_v59 = vpop.eup %358  ;;  %v126_v60 = vadd.f32 1.0, %v357_v54  ;;  %vm756_vm7 = vcmp.eq.s32.totalorder %v544_v6, 4  ;;  %v129_v2 = vmul.f32 -0.5, %v357_v54  ;;  %v619_v4 = vadd.f32 %v181_v56, %v180_v45 }
  0x4a   :  { %v361_v63 = vpop.eup %360  ;;  %362 = vlog2.f32 %v117_v55  ;;  %v135_v0 = vadd.f32 1.0, %v359_v59  ;;  %v138_v5 = vmul.f32 -0.5, %v359_v59  ;;  %v211_v9 = vrot.slane %v210_v61, 4 }
  0x4b   :  { %364 = vlog2.f32 %v126_v60  ;;  %v144_v3 = vadd.f32 1.0, %v361_v63  ;;  %v239_v10 = vadd.f32 %v238_v62, %v236_v57  ;;  %vm758_vm11 = vcmp.eq.s32.totalorder %v546_v7, 4 }
  0x4c   :  { %366 = vlog2.f32 %v135_v0  ;;  %v123_v11 = vand.u32 2147483647, %v355_v51  ;;  %v264_v12 = vsel %vm247_vm12, 1.0, %v469_v18  ;;  %v265_v13 = vsel %vm755_vm13, 1.0, %v469_v18 }
  0x4d   :  { %368 = vlog2.f32 %v144_v3  ;;  %v121_v14 = vadd.f32 1.0, %v120_v1  ;;  %v147_v15 = vmul.f32 -0.5, %v361_v63  ;;  %vm279_vm5 = vcmp.eq.s32.totalorder %v548_v8, 4 }
  0x4e   :  { %vm280_vm10 = vcmp.eq.s32.totalorder %v558_v20, 4  ;;  %v130_v16 = vadd.f32 1.0, %v129_v2  ;;  %v132_v17 = vand.u32 2147483647, %v357_v54  ;;  %v141_v19 = vand.u32 2147483647, %v359_v59 }
  0x4f   :  { %v266_v21 = vsel %vm757_vm14, 1.0, %v469_v18  ;;  %v139_v22 = vadd.f32 1.0, %v138_v5  ;;  %v633_v23 = vadd.f32 %v211_v9, %v210_v61  ;;  %v268_v24 = vadd.f32 %v265_v13, %v264_v12 }
  0x50   :  { %v294_v25 = vsel %vm756_vm7, 1.0, %v469_v18  ;;  %vm638_vm13 = vcmp.lt.f32.partialorder %v123_v11, 0.0004427343  ;;  %v150_v27 = vand.u32 2147483647, %v361_v63  ;;  %v267_v28 = vsel %vm250_vm15, 1.0, %v469_v18 }
  0x51   :  { %v295_v29 = vsel %vm758_vm11, 1.0, %v469_v18  ;;  %v122_v30 = vmul.f32 %v355_v51, %v121_v14  ;;  %v148_v31 = vadd.f32 1.0, %v147_v15  ;;  %v648_v32 = vadd.f32 %v239_v10, %v237_v58 }
  0x52   :  { %v269_v33 = vadd.f32 %v268_v24, %v266_v21  ;;  %v131_v35 = vmul.f32 %v357_v54, %v130_v16  ;;  %vm650_vm7 = vcmp.lt.f32.partialorder %v132_v17, 0.0004427343  ;;  %vm654_vm14 = vcmp.lt.f32.partialorder %v141_v19, 0.0004427343 }
  0x53   :  { %v298_v38 = vadd.f32 %v295_v29, %v294_v25  ;;  %v140_v41 = vmul.f32 %v359_v59, %v139_v22  ;;  %v296_v43 = vsel %vm279_vm5, 1.0, %v469_v18  ;;  %vm661_vm11 = vcmp.lt.f32.partialorder %v150_v27, 0.0004427343 }
  0x54   :  { %v363_v34 = vpop.eup %362  ;;  %v270_v42 = vadd.f32 %v269_v33, %v267_v28  ;;  %v183_v49 = vrot.slane %v619_v4, 2  ;;  %v213_v50 = vrot.slane %v633_v23, 2  ;;  %v149_v55 = vmul.f32 %v361_v63, %v148_v31 }
  0x55   :  { %v365_v39 = vpop.eup %364  ;;  %v119_v40 = vmul.f32 0.6931472, %v363_v34  ;;  %v241_v56 = vrot.slane %v648_v32, 4  ;;  %v297_v60 = vsel %vm280_vm10, 1.0, %v469_v18  ;;  %v299_v61 = vadd.f32 %v298_v38, %v296_v43 }
  0x56   :  { %v367_v45 = vpop.eup %366  ;;  %v128_v46 = vmul.f32 0.6931472, %v365_v39  ;;  %v271_v63 = vrot.slane %v270_v42, 4 }
  0x57   :  { %v125_v51 = vsel %vm638_vm13, %v122_v30, %v119_v40  ;;  %v137_v54 = vmul.f32 0.6931472, %v367_v45  ;;  %v369_v57 = vpop.eup %368  ;;  %v300_v17 = vadd.f32 %v299_v61, %v297_v60  ;;  %v242_v38 = vadd.f32 %v241_v56, %v648_v32 }
  0x58   :  { %v134_v58 = vsel %vm650_vm7, %v131_v35, %v128_v46  ;;  %v153_v59 = vadd.f32 %v125_v51, %v586_v44  ;;  %v146_v0 = vmul.f32 0.6931472, %v369_v57  ;;  %vm773_vm7 = vcmp.eq.s32.totalorder %v544_v6, 4 }
  0x59   :  { %v143_v62 = vsel %vm654_vm14, %v140_v41, %v137_v54  ;;  %v154_v1 = vadd.f32 %v134_v58, %v591_v47  ;;  %v272_v46 = vadd.f32 %v271_v63, %v270_v42  ;;  %v301_v54 = vrot.slane %v300_v17, 4 }
  0x5a   :  { %v155_v2 = vadd.f32 %v143_v62, %v602_v52  ;;  %v161_v3 = vsel %vm157_vm0, %v153_v59, 0.0  ;;  %v191_v44 = vsel %vm187_vm3, %v153_v59, 0.0  ;;  %v221_v5 = vsel %vm217_vm8, %v153_v59, 0.0 }
  0x5b   :  { %v152_v18 = vsel %vm661_vm11, %v149_v55, %v146_v0  ;;  %v162_v9 = vsel %vm158_vm1, %v154_v1, 0.0  ;;  %v192_v47 = vsel %vm188_vm4, %v154_v1, 0.0  ;;  %v222_v52 = vsel %vm218_vm9, %v154_v1, 0.0 }
  0x5c   :  { %v156_v10 = vadd.f32 %v152_v18, %v604_v53  ;;  %v163_v11 = vsel %vm159_vm2, %v155_v2, 0.0  ;;  %v165_v12 = vadd.f32 %v162_v9, %v161_v3  ;;  %v193_v13 = vsel %vm189_vm6, %v155_v2, 0.0 }
  0x5d   :  { %v195_v14 = vadd.f32 %v192_v47, %v191_v44  ;;  %vm767_vm0 = vcmp.eq.s32.totalorder %v548_v8, 2  ;;  %v225_v16 = vadd.f32 %v222_v52, %v221_v5  ;;  %vm768_vm1 = vcmp.eq.s32.totalorder %v558_v20, 0 }
  0x5e   :  { %v223_v15 = vsel %vm767_vm0, %v155_v2, 0.0  ;;  %v164_v19 = vsel %vm768_vm1, %v156_v10, 0.0  ;;  %v166_v21 = vadd.f32 %v165_v12, %v163_v11  ;;  %vm769_vm3 = vcmp.eq.s32.totalorder %v558_v20, 1 }
  0x5f   :  { %v194_v53 = vsel %vm769_vm3, %v156_v10, 0.0  ;;  %vm770_vm4 = vcmp.eq.s32.totalorder %v558_v20, 2  ;;  %v196_v24 = vadd.f32 %v195_v14, %v193_v13  ;;  %v226_v25 = vadd.f32 %v225_v16, %v223_v15 }
  0x60   :  { %v224_v22 = vsel %vm770_vm4, %v156_v10, 0.0  ;;  %v251_v26 = vsel %vm247_vm12, %v153_v59, 0.0  ;;  %vm771_vm2 = vcmp.eq.s32.totalorder %v546_v7, 3  ;;  %v167_v28 = vadd.f32 %v166_v21, %v164_v19 }
  0x61   :  { %v252_v27 = vsel %vm771_vm2, %v154_v1, 0.0  ;;  %vm772_vm6 = vcmp.eq.s32.totalorder %v548_v8, 3  ;;  %v254_v30 = vsel %vm250_vm15, %v156_v10, 0.0  ;;  %v197_v33 = vadd.f32 %v196_v24, %v194_v53 }
  0x62   :  { %v253_v29 = vsel %vm772_vm6, %v155_v2, 0.0  ;;  %v255_v31 = vadd.f32 %v252_v27, %v251_v26  ;;  %v227_v34 = vadd.f32 %v226_v25, %v224_v22  ;;  %v281_v35 = vsel %vm773_vm7, %v153_v59, 0.0 }
  0x63   :  { %vm774_vm8 = vcmp.eq.s32.totalorder %v546_v7, 4  ;;  %v168_v37 = vrot.slane %v167_v28, 4  ;;  %v283_v40 = vsel %vm279_vm5, %v155_v2, 0.0  ;;  %v198_v41 = vrot.slane %v197_v33, 4 }
  0x64   :  { %v282_v36 = vsel %vm774_vm8, %v154_v1, 0.0  ;;  %v256_v39 = vadd.f32 %v255_v31, %v253_v29  ;;  %v228_v43 = vrot.slane %v227_v34, 4  ;;  %v284_v6 = vsel %vm280_vm10, %v156_v10, 0.0 }
  0x65   :  { %v285_v45 = vadd.f32 %v282_v36, %v281_v35  ;;  %v169_v48 = vadd.f32 %v168_v37, %v167_v28  ;;  %vm309_vm9 = vcmask 1040384   ;;  %v199_v7 = vadd.f32 %v198_v41, %v197_v33 }
  0x66   :  { %v257_v51 = vadd.f32 %v256_v39, %v254_v30  ;;  %v229_v55 = vadd.f32 %v228_v43, %v227_v34  ;;  %v273_v58 = vrot.slane %v272_v46, 2  ;;  %v243_v56 = vrot.slane %v242_v38, 2 }
  0x67   :  { %v286_v57 = vadd.f32 %v285_v45, %v283_v40  ;;  %v170_v32 = vrot.slane %v169_v48, 2  ;;  %v302_v8 = vadd.f32 %v301_v54, %v300_v17  ;;  %v200_v60 = vrot.slane %v199_v7, 2 }
  0x68   :  { %v258_v59 = vrot.slane %v257_v51, 4  ;;  %v230_v61 = vrot.slane %v229_v55, 2  ;;  %v274_v0 = vadd.f32 %v273_v58, %v272_v46  ;;  %v184_v20 = vadd.f32 %v183_v49, %v619_v4 }
  0x69   :  { %v287_v62 = vadd.f32 %v286_v57, %v284_v6  ;;  %v171_v42 = vadd.f32 %v170_v32, %v169_v48  ;;  %v303_v63 = vrot.slane %v302_v8, 2  ;;  %v201_v2 = vadd.f32 %v200_v60, %v199_v7 }
  0x6a   :  { %v259_v1 = vadd.f32 %v258_v59, %v257_v51  ;;  %v231_v3 = vadd.f32 %v230_v61, %v229_v55  ;;  %v275_v5 = vrot.slane %v274_v0, 1  ;;  %v214_v9 = vadd.f32 %v213_v50, %v633_v23 }
  0x6b   :  { %v288_v44 = vrot.slane %v287_v62, 4  ;;  %v172_v18 = vrot.slane %v171_v42, 1  ;;  %v304_v52 = vadd.f32 %v303_v63, %v302_v8  ;;  %v202_v10 = vrot.slane %v201_v2, 1 }
  0x6c   :  { %v260_v47 = vrot.slane %v259_v1, 2  ;;  %v232_v11 = vrot.slane %v231_v3, 1  ;;  %v244_v12 = vadd.f32 %v243_v56, %v242_v38  ;;  %v276_v4 = vadd.f32 %v275_v5, %v274_v0 }
  0x6d   :  { %v289_v13 = vadd.f32 %v288_v44, %v287_v62  ;;  %v173_v14 = vadd.f32 %v172_v18, %v171_v42  ;;  %v305_v49 = vrot.slane %v304_v52, 1  ;;  %v203_v16 = vadd.f32 %v202_v10, %v201_v2 }
  0x6e   :  { %v261_v15 = vadd.f32 %v260_v47, %v259_v1  ;;  %v233_v17 = vadd.f32 %v232_v11, %v231_v3  ;;  %vm311_vm5 = vcmask 1041408   ;;  %v185_v21 = vrot.slane %v184_v20, 1 }
  0x6f   :  { %v290_v19 = vrot.slane %v289_v13, 2  ;;  %v306_v22 = vadd.f32 %v305_v49, %v304_v52  ;;  %v215_v24 = vrot.slane %v214_v9, 1  ;;  %v310_v23 = vsel %vm309_vm9, %v173_v14, %v203_v16 }
  0x70   :  { %v262_v53 = vrot.slane %v261_v15, 1  ;;  %vm313_vm10 = vcmask 1042432   ;;  %v245_v50 = vrot.slane %v244_v12, 1  ;;  %v312_v27 = vsel %vm311_vm5, %v310_v23, %v233_v17 }
  0x71   :  { %v291_v25 = vadd.f32 %v290_v19, %v289_v13  ;;  %v323_v28 = vsel %vm309_vm9, %v276_v4, %v306_v22  ;;  %v186_v31 = vadd.f32 %v185_v21, %v184_v20  ;;  %vm315_vm11 = vcmask 1043456  }
  0x72   :  { %v263_v26 = vadd.f32 %v262_v53, %v261_v15  ;;  %v324_v30 = vsel %vm311_vm5, %v323_v28, 0.0  ;;  %v216_v34 = vadd.f32 %v215_v24, %v214_v9  ;;  %vm317_vm12 = vcmask 1044480  }
  0x73   :  { %v292_v29 = vrot.slane %v291_v25, 1  ;;  %v246_v36 = vadd.f32 %v245_v50, %v244_v12  ;;  %vm319_vm13 = vcmask 1045504   ;;  %328 = vst [vmem:[#allocation8 + $0x8] sm:$0xff] %v324_v30  ;;  %vm321_vm14 = vcmask 1046528  }
  0x74   :  { %v314_v33 = vsel %vm313_vm10, %v312_v27, %v263_v26 }
  0x75   :  { %v293_v35 = vadd.f32 %v292_v29, %v291_v25 }
  0x77   :  { %v316_v37 = vsel %vm315_vm11, %v314_v33, %v293_v35 }
  0x78   :  { %v318_v38 = vsel %vm317_vm12, %v316_v37, %v186_v31 }
  0x79   :  { %v320_v39 = vsel %vm319_vm13, %v318_v38, %v216_v34 }
  0x7a   :  { %v322_v40 = vsel %vm321_vm14, %v320_v39, %v246_v36 }
  0x7b   :  { %327 = vst [vmem:[#allocation8] sm:$0xff] %v322_v40 }
  0x7c   :  { %447 = shalt.err (!%p444_p0)
}
  0x7d   :  { %s448_s27 = scalar_lea.hbm %s750_s3, 256 }
  0x7e   :  { %p449_p1 = scmp.ne.s32.totalorder %s750_s3, %s448_s27  ;;  %p452_p2 = scmp.lt.u32.totalorder %s448_s27, %s750_s3 }
  0x80   :  { %p454_p3 = pnand %p452_p2, %p449_p1 }
  0x82   :  { %457 = shalt.err (!%p454_p3)
}
  0x83   :  { %340 = dma.vmem_to_hbm [thread:$0]  %s335_s21, 256, %s750_s3, [#allocation4], %s466_s24, %s466_s24, %s467_s25  }
  0x84   :  { %462 = dma.done.wait [#allocation4], 256  }
  0x85   :  { %463 = vsyncadd [#allocation4], 4294967040 }
  0x86   :  { %344 = vsyncpa [#allocation3], 1 }
  0x87   :  { %345 = vsyncpa [#allocation6], 1 }
  0x88   :  { %346 = vsyncpa [#allocation4], 1 }

</bundles_post_ra>
